<compile_context>
chip_gen: v7x
topology: tpu7x:2x2x1
jax: 0.10.0
libtpu: 0.0.40
codegen_flags: <defaults>
</compile_context>

<pallas_src>
import jax
import jax.numpy as jnp
from jax import lax
from jax.experimental import pallas as pl
from jax.experimental.pallas import tpu as pltpu

_LANES = 128
_MAX_BLOCK_ROWS = 2048                     # multiple of every sublane count used
_MAX_BLOCK_LANES = 4096                    # f32 lane cap; widened for narrow dtypes
_BLOCK_BYTE_BUDGET = 4 * 1024 * 1024       # per input stream per block (~2-4 MiB target)
_VMEM_LIMIT_BYTES = 48 * 1024 * 1024       # 2 streams x 2 bufs x 4 MiB + acc + temps << limit


def _round_up(a, b):
    return ((a + b - 1) // b) * b


def _round_down(a, b):
    return (a // b) * b


def _cdiv(a, b):
    return (a + b - 1) // b


def _choose_blocks(R, K, itemsize):
    """Pick (TR, TK) from a per-block byte budget with dtype-aware alignment."""
    sublane = max(8, 32 // itemsize)                       # 8 f32 / 16 bf16 / 32 int8
    lane_cap = min(2 * _MAX_BLOCK_LANES,
                   _MAX_BLOCK_LANES * max(1, 4 // itemsize))
    Kp = _round_up(K, _LANES)
    Rp = _round_up(R, sublane)
    TK = min(Kp, lane_cap)
    rows_budget = max(sublane,
                      _round_down(_BLOCK_BYTE_BUDGET // (TK * itemsize), sublane))
    TR = min(Rp, rows_budget, _MAX_BLOCK_ROWS)
    return TR, TK


def _fold(vals):
    """Sum a list of (TR, 128) f32 arrays via a few independent partial chains."""
    n_par = min(4, len(vals))
    parts = list(vals[:n_par])
    for j in range(n_par, len(vals)):
        parts[j % n_par] = parts[j % n_par] + vals[j]
    while len(parts) > 1:
        nxt = [parts[i] + parts[i + 1] for i in range(0, len(parts) - 1, 2)]
        if len(parts) % 2:
            nxt.append(parts[-1])
        parts = nxt
    return parts[0]


def _make_kernel(K, TR, TK, n_k, n_k_per_split, n_split):
    """Kernel: per-row, per-lane partial sums of (x - y)**2, weighted at finalize."""
    n_groups = TK // _LANES
    need_col_mask = (K % TK) != 0
    has_overflow = n_split * n_k_per_split > n_k
    last_cols = K - (n_k - 1) * TK          # valid columns in the ragged last k block

    def kernel(x_ref, y_ref, w_ref, acc_ref):
        k = pl.program_id(2)
        if n_split > 1:
            g = pl.program_id(0) * n_k_per_split + k     # global column-block index
        else:
            g = k

        @pl.when(k == 0)
        def _init():
            acc_ref[...] = jnp.zeros_like(acc_ref)

        def strip_sq(j):
            x = x_ref[:, j * _LANES:(j + 1) * _LANES].astype(jnp.float32)
            y = y_ref[:, j * _LANES:(j + 1) * _LANES].astype(jnp.float32)
            d = x - y
            return d * d

        def accum_full():
            acc_ref[...] += _fold([strip_sq(j) for j in range(n_groups)])

        def accum_last():
            # Only the last k block is ragged: full strips run unmasked, strips
            # entirely past K are skipped, and at most ONE strip gets a
            # compile-time-constant lane mask.
            n_full = last_cols // _LANES
            n_part = last_cols % _LANES
            vals = [strip_sq(j) for j in range(n_full)]
            if n_part:
                lane = lax.broadcasted_iota(jnp.int32, (TR, _LANES), 1)
                vals.append(jnp.where(lane < n_part, strip_sq(n_full), 0.0))
            acc_ref[...] += _fold(vals)

        if need_col_mask:
            if n_k > 1:
                @pl.when(g < n_k - 1)
                def _unmasked():
                    accum_full()

            @pl.when(g == n_k - 1)
            def _masked():
                accum_last()
        elif has_overflow:
            @pl.when(g < n_k)
            def _guarded():
                accum_full()
        else:
            accum_full()

        # Fold the per-(batch, channel) weight in at the end of the reduction so the
        # wrapper tail is a single sum (per-split weighted partials add up correctly).
        @pl.when(k == n_k_per_split - 1)
        def _finalize():
            acc_ref[...] = acc_ref[...] * w_ref[...]

    return kernel


def weighted_mse_loss(inputs, targets, weights, reduction="mean"):
    """Pallas implementation of weighted_MSELoss.forward (reduction 'mean'/'sum')."""
    assert inputs.shape == targets.shape
    if reduction not in ("mean", "sum"):
        # TODO(synk): reduction='none' returns the full per-element tensor; only the
        # reduced variants are implemented as a Pallas kernel here.
        raise NotImplementedError("only 'mean' and 'sum' reductions are implemented")

    shape = tuple(int(d) for d in inputs.shape)
    assert len(shape) >= 2, "expected at least (batch, channel, ...) layout"
    B, C = shape[0], shape[1]
    K = 1
    for d in shape[2:]:
        K *= d
    R = B * C
    N = R * K

    # Per-(batch, channel) weights (module's use case: (1, C, 1, 1)). Right-align
    # like PyTorch broadcasting; require the spatial dims of the weight to be 1.
    w_arr = jnp.asarray(weights, dtype=jnp.float32)
    assert w_arr.ndim <= len(shape)
    ws = (1,) * (len(shape) - w_arr.ndim) + tuple(int(d) for d in w_arr.shape)
    if any(d != 1 for d in ws[2:]):
        # TODO(synk): spatially-varying weights would need a third full-size HBM
        # stream (or an in-kernel weight gather); not needed for the per-channel case.
        raise NotImplementedError("weights must be constant over spatial dims")
    w_rows = jnp.broadcast_to(w_arr.reshape(ws[:2]), (B, C)).reshape(R)

    # Free reshapes (contiguous dim merges) — no extra HBM passes over the data.
    x2 = inputs.reshape(R, K)
    y2 = targets.reshape(R, K)

    itemsize = jnp.dtype(inputs.dtype).itemsize
    TR, TK = _choose_blocks(R, K, itemsize)
    n_r = _cdiv(R, TR)
    n_k = _cdiv(K, TK)

    # v7x has 2 TensorCores: when there is only one row block, split the K
    # reduction into two independent 'parallel' chunks so both cores get work.
    n_split = 2 if (n_r == 1 and n_k >= 4) else 1
    n_k_per_split = _cdiv(n_k, n_split)
    has_overflow = n_split * n_k_per_split > n_k

    # Tiny padded per-row weight column (padded rows are discarded in the wrapper).
    rows_padded = n_r * TR
    if rows_padded > R:
        w_rows = jnp.pad(w_rows, (0, rows_padded - R))
    w_col = w_rows.reshape(rows_padded, 1)

    if has_overflow:
        def xy_map(s, i, k):
            return (i, jnp.minimum(s * n_k_per_split + k, n_k - 1))
    else:
        def xy_map(s, i, k):
            return (i, s * n_k_per_split + k)

    kernel = _make_kernel(K, TR, TK, n_k, n_k_per_split, n_split)

    partials = pl.pallas_call(
        kernel,
        out_shape=jax.ShapeDtypeStruct((n_split, rows_padded, _LANES), jnp.float32),
        grid_spec=pltpu.PrefetchScalarGridSpec(
            num_scalar_prefetch=0,
            grid=(n_split, n_r, n_k_per_split),
            in_specs=[
                pl.BlockSpec((TR, TK), xy_map),
                pl.BlockSpec((TR, TK), xy_map),
                pl.BlockSpec((TR, 1), lambda s, i, k: (i, 0)),
            ],
            out_specs=pl.BlockSpec((None, TR, _LANES), lambda s, i, k: (s, i, 0)),
        ),
        compiler_params=pltpu.CompilerParams(
            # Split/row blocks own disjoint output slabs -> parallel (v7x megacore);
            # the column axis reduces into the resident accumulator -> arbitrary, last.
            dimension_semantics=("parallel", "parallel", "arbitrary"),
            vmem_limit_bytes=_VMEM_LIMIT_BYTES,
        ),
    )(x2, y2, w_col)

    # Tiny finishing reduction: drop padded rows (keeps unspecified OOB block
    # contents out of the result), sum the already-weighted per-lane partials.
    total = jnp.sum(partials[:, :R, :])

    if reduction == "mean":
        return total / jnp.float32(N)
    return total


if __name__ == "__main__":
    key = jax.random.PRNGKey(0)
    k1, k2 = jax.random.split(key, 2)

    B, C, H, W = 2, 4, 16, 16  # layout: NCHW
    inputs = jax.random.normal(k1, (B, C, H, W), dtype=jnp.float32)
    targets = jax.random.normal(k2, (B, C, H, W), dtype=jnp.float32)
    # Deterministic per-channel weights, broadcast over (B, 1, H, W) like PyTorch.
    weights = (jnp.arange(1, C + 1, dtype=jnp.float32) / C).reshape(1, C, 1, 1)

    out = weighted_mse_loss(inputs, targets, weights, reduction="mean")
    out = jax.block_until_ready(out)

    # Pure-JAX reference check.
    ref = jnp.mean((inputs - targets) ** 2 * weights)
    assert jnp.allclose(out, ref, rtol=1e-5, atol=1e-6), (out, ref)

    print("KERNEL_OK")
</pallas_src>

<mosaic_0001>
module attributes {stable_mosaic.version = 11 : i64} {
  func.func @kernel(%arg0: i32, %arg1: i32, %arg2: i32, %arg3: memref<8x256xf32, #tpu.memory_space<vmem>>, %arg4: memref<8x256xf32, #tpu.memory_space<vmem>>, %arg5: memref<8x1xf32, #tpu.memory_space<vmem>>, %arg6: memref<1x8x128xf32, #tpu.memory_space<vmem>>) attributes {dimension_semantics = [#tpu.dimension_semantics<parallel>, #tpu.dimension_semantics<parallel>, #tpu.dimension_semantics<arbitrary>], iteration_bounds = array<i64: 1, 1, 1>, scalar_prefetch = 0 : i64, scratch_operands = 0 : i64, tpu.core_type = #tpu.core_type<tc>, window_params = [{transform_indices = @transform_0, window_bounds = array<i64: 8, 256>}, {transform_indices = @transform_1, window_bounds = array<i64: 8, 256>}, {transform_indices = @transform_2, window_bounds = array<i64: 8, 1>}, {transform_indices = @transform_3, window_bounds = array<i64: 1, 8, 128>}]} {
    %c0_i32 = arith.constant 0 : i32
    %0 = arith.cmpi eq, %arg2, %c0_i32 : i32
    %1 = arith.extui %0 : i1 to i32
    %c0_i32_0 = arith.constant 0 : i32
    %2 = arith.cmpi ne, %1, %c0_i32_0 : i32
    scf.if %2 {
      %cst = arith.constant 0.000000e+00 : f32
      %21 = vector.broadcast %cst : f32 to vector<8x128xf32>
      %c0_15 = arith.constant 0 : index
      %c0_16 = arith.constant 0 : index
      %c0_17 = arith.constant 0 : index
      %22 = vector.load %arg6[%c0_15, %c0_16, %c0_17] : memref<1x8x128xf32, #tpu.memory_space<vmem>>, vector<1x8x128xf32>
      %23 = vector.shape_cast %22 : vector<1x8x128xf32> to vector<8x128xf32>
      %24 = vector.shape_cast %21 : vector<8x128xf32> to vector<1x8x128xf32>
      tpu.vector_store %arg6[%c0_15, %c0_16, %c0_17], %24 {strides = array<i32>} : memref<1x8x128xf32, #tpu.memory_space<vmem>>, vector<1x8x128xf32>,
    } else {
    }
    %c0 = arith.constant 0 : index
    %c0_1 = arith.constant 0 : index
    %c0_2 = arith.constant 0 : index
    %3 = vector.load %arg6[%c0, %c0_1, %c0_2] : memref<1x8x128xf32, #tpu.memory_space<vmem>>, vector<1x8x128xf32>
    %4 = vector.shape_cast %3 : vector<1x8x128xf32> to vector<8x128xf32>
    %c0_3 = arith.constant 0 : index
    %c0_4 = arith.constant 0 : index
    %5 = vector.load %arg3[%c0_3, %c0_4] : memref<8x256xf32, #tpu.memory_space<vmem>>, vector<8x128xf32>
    %c0_5 = arith.constant 0 : index
    %c0_6 = arith.constant 0 : index
    %6 = vector.load %arg4[%c0_5, %c0_6] : memref<8x256xf32, #tpu.memory_space<vmem>>, vector<8x128xf32>
    %7 = arith.subf %5, %6 : vector<8x128xf32>
    %8 = arith.mulf %7, %7 : vector<8x128xf32>
    %c0_7 = arith.constant 0 : index
    %c128 = arith.constant 128 : index
    %9 = vector.load %arg3[%c0_7, %c128] : memref<8x256xf32, #tpu.memory_space<vmem>>, vector<8x128xf32>
    %c0_8 = arith.constant 0 : index
    %c128_9 = arith.constant 128 : index
    %10 = vector.load %arg4[%c0_8, %c128_9] : memref<8x256xf32, #tpu.memory_space<vmem>>, vector<8x128xf32>
    %11 = arith.subf %9, %10 : vector<8x128xf32>
    %12 = arith.mulf %11, %11 : vector<8x128xf32>
    %13 = arith.addf %8, %12 : vector<8x128xf32>
    %14 = arith.addf %4, %13 : vector<8x128xf32>
    %c0_10 = arith.constant 0 : index
    %c0_11 = arith.constant 0 : index
    %c0_12 = arith.constant 0 : index
    %15 = vector.load %arg6[%c0_10, %c0_11, %c0_12] : memref<1x8x128xf32, #tpu.memory_space<vmem>>, vector<1x8x128xf32>
    %16 = vector.shape_cast %15 : vector<1x8x128xf32> to vector<8x128xf32>
    %17 = vector.shape_cast %14 : vector<8x128xf32> to vector<1x8x128xf32>
    tpu.vector_store %arg6[%c0_10, %c0_11, %c0_12], %17 {strides = array<i32>} : memref<1x8x128xf32, #tpu.memory_space<vmem>>, vector<1x8x128xf32>,
    %c0_i32_13 = arith.constant 0 : i32
    %18 = arith.cmpi eq, %arg2, %c0_i32_13 : i32
    %19 = arith.extui %18 : i1 to i32
    %c0_i32_14 = arith.constant 0 : i32
    %20 = arith.cmpi ne, %19, %c0_i32_14 : i32
    scf.if %20 {
      %c0_15 = arith.constant 0 : index
      %c0_16 = arith.constant 0 : index
      %c0_17 = arith.constant 0 : index
      %21 = vector.load %arg6[%c0_15, %c0_16, %c0_17] : memref<1x8x128xf32, #tpu.memory_space<vmem>>, vector<1x8x128xf32>
      %22 = vector.shape_cast %21 : vector<1x8x128xf32> to vector<8x128xf32>
      %c0_18 = arith.constant 0 : index
      %c0_19 = arith.constant 0 : index
      %23 = vector.load %arg5[%c0_18, %c0_19] : memref<8x1xf32, #tpu.memory_space<vmem>>, vector<8x1xf32>
      %24 = vector.broadcast %23 : vector<8x1xf32> to vector<8x128xf32>
      %25 = arith.mulf %22, %24 : vector<8x128xf32>
      %c0_20 = arith.constant 0 : index
      %c0_21 = arith.constant 0 : index
      %c0_22 = arith.constant 0 : index
      %26 = vector.load %arg6[%c0_20, %c0_21, %c0_22] : memref<1x8x128xf32, #tpu.memory_space<vmem>>, vector<1x8x128xf32>
      %27 = vector.shape_cast %26 : vector<1x8x128xf32> to vector<8x128xf32>
      %28 = vector.shape_cast %25 : vector<8x128xf32> to vector<1x8x128xf32>
      tpu.vector_store %arg6[%c0_20, %c0_21, %c0_22], %28 {strides = array<i32>} : memref<1x8x128xf32, #tpu.memory_space<vmem>>, vector<1x8x128xf32>,
    } else {
    }
    return
  }
  func.func @transform_0(%arg0: i32, %arg1: i32, %arg2: i32) -> (i32, i32) {
    %c1_i32 = arith.constant 1 : i32
    %0 = arith.muli %arg0, %c1_i32 : i32
    %1 = arith.addi %0, %arg2 : i32
    %c0_i32 = arith.constant 0 : i32
    return %arg1, %1 : i32, i32
  }
  func.func @transform_1(%arg0: i32, %arg1: i32, %arg2: i32) -> (i32, i32) {
    %c1_i32 = arith.constant 1 : i32
    %0 = arith.muli %arg0, %c1_i32 : i32
    %1 = arith.addi %0, %arg2 : i32
    %c0_i32 = arith.constant 0 : i32
    return %arg1, %1 : i32, i32
  }
  func.func @transform_2(%arg0: i32, %arg1: i32, %arg2: i32) -> (i32, i32) {
    %c0_i32 = arith.constant 0 : i32
    %c0_i32_0 = arith.constant 0 : i32
    return %arg1, %c0_i32 : i32, i32
  }
  func.func @transform_3(%arg0: i32, %arg1: i32, %arg2: i32) -> (i32, i32, i32) {
    %c0_i32 = arith.constant 0 : i32
    %c0_i32_0 = arith.constant 0 : i32
    return %arg0, %arg1, %c0_i32 : i32, i32, i32
  }
}

</mosaic_0001>

<bundles_post_ra>
// kernel: tpu_custom_call.1
= control target key start
LH: loop header
LB: loop body
LE: loop exit
PB: predicated region body
PF: predicated region fallthrough
CT: control target
= control target key end

     0   :  { %8 = vsyncpa [#allocation3], 0  ;;  %s237_s0 = inlined_call_operand.hbm [shape: f32[8,256], index: 0, kind: input, shape index: {}]   ;;  %s238_s1 = inlined_call_operand.hbm [shape: f32[8,256], index: 1, kind: input, shape index: {}]   ;;  %s239_s2 = inlined_call_operand.vmem [shape: f32[8,1], index: 2, kind: input, shape index: {}]   ;;  %s240_s3 = inlined_call_operand.hbm [shape: f32[1,8,128], index: 3, kind: output, shape index: {}]  }
   0x1   :  { %9 = vsyncpa [#allocation6], 0 }
   0x2   :  { %10 = vsyncpa [#allocation4], 0  ;;  %s174_s12 = smov [#allocation2]   ;;  %s175_s14 = smov [#allocation5]  }
   0x3   :  { %s21_s13 = sshll.u32 %s174_s12, 4  ;;  %s35_s15 = sshll.u32 %s175_s14, 4  ;;  %s22_s13 = int_to_ptr.vmem [resolvable:$true] %s21_s13  ;;  %s36_s15 = int_to_ptr.vmem [resolvable:$true] %s35_s15 }
   0x4   :  { %s102_s18 = scalar_lea.hbm %s237_s0, 256 }
   0x5   :  { %p103_p0 = scmp.ne.s32.totalorder %s237_s0, %s102_s18  ;;  %p106_p1 = scmp.lt.u32.totalorder %s102_s18, %s237_s0 }
   0x7   :  { %p108_p2 = pnand %p106_p1, %p103_p0 }
   0x9   :  { %111 = shalt.err (!%p108_p2)
}
   0xa   :  { %s112_s23 = scalar_lea.vmem %s22_s13, 256  ;;  %p117_p4 = scmp.lt.s32.totalorder %s22_s13, %s22_s13 }
   0xb   :  { %p113_p3 = scmp.ne.s32.totalorder %s22_s13, %s112_s23  ;;  %p118_p5 = scmp.lt.s32.totalorder %s112_s23, %s112_s23 }
   0xd   :  { %p119_p6 = por %p118_p5, %p117_p4 }
   0xf   :  { %p120_p7 = pnand %p119_p6, %p113_p3 }
  0x11   :  { %123 = shalt.err (!%p120_p7)
}
  0x12   :  { %24 = dma.hbm_to_vmem [thread:$0]  %s237_s0, 256, %s22_s13, [#allocation3]  }
  0x13   :  { %s124_s28 = scalar_lea.hbm %s238_s1, 256 }
  0x14   :  { %p125_p8 = scmp.ne.s32.totalorder %s238_s1, %s124_s28  ;;  %p128_p9 = scmp.lt.u32.totalorder %s124_s28, %s238_s1 }
  0x16   :  { %p130_p10 = pnand %p128_p9, %p125_p8 }
  0x18   :  { %133 = shalt.err (!%p130_p10)
}
  0x19   :  { %s134_s6 = scalar_lea.vmem %s36_s15, 256  ;;  %p139_p12 = scmp.lt.s32.totalorder %s36_s15, %s36_s15 }
  0x1a   :  { %p135_p11 = scmp.ne.s32.totalorder %s36_s15, %s134_s6  ;;  %p140_p13 = scmp.lt.s32.totalorder %s134_s6, %s134_s6 }
  0x1c   :  { %p141_p0 = por %p140_p13, %p139_p12 }
  0x1e   :  { %p142_p1 = pnand %p141_p0, %p135_p11 }
  0x20   :  { %145 = shalt.err (!%p142_p1)
}
  0x21   :  { %38 = dma.hbm_to_vmem [thread:$0]  %s238_s1, 256, %s36_s15, [#allocation6]  }
  0x22   :  { %168 = dma.done.wait [#allocation3], 256  }
  0x23   :  { %169 = vsyncadd [#allocation3], 4294967040 }
  0x24   :  { %170 = dma.done.wait [#allocation6], 256  }
  0x25   :  { %171 = vsyncadd [#allocation6], 4294967040  ;;  %v176_v0 = vmov 0   ;;  %v72_v1 = vld [vmem:[%s239_s2] sm:$0xff]  ;;  %v58_v3 = vld [vmem:[#allocation5] sm:$0xff]  ;;  %s177_s1 = smov [#allocation7]  }
  0x26   :  { %101 = vset.pattern.permute.xlu0 %v176_v0  ;;  %v57_v2 = vld [vmem:[#allocation2] sm:$0xff]  ;;  %v61_v4 = vld [vmem:[#allocation2 + $0x8] sm:$0xff]  ;;  %v62_v5 = vld [vmem:[#allocation5 + $0x8] sm:$0xff]  ;;  %s86_s10 = sshll.u32 %s177_s1, 4  ;;  %s87_s10 = int_to_ptr.vmem [resolvable:$true] %s86_s10 }
  0x27   :  { %75 = vperm.xlu0 %101, %v72_v1   ;;  %v59_v6 = vsub.f32 %v57_v2, %v58_v3  ;;  %v63_v7 = vsub.f32 %v61_v4, %v62_v5  ;;  %s146_s11 = scalar_lea.vmem %s87_s10, 128  ;;  %p151_p3 = scmp.lt.s32.totalorder %s87_s10, %s87_s10 }
  0x28   :  { %p147_p2 = scmp.ne.s32.totalorder %s87_s10, %s146_s11  ;;  %p152_p4 = scmp.lt.s32.totalorder %s146_s11, %s146_s11 }
  0x29   :  { %v60_v8 = vmul.f32 %v59_v6, %v59_v6  ;;  %v64_v9 = vmul.f32 %v63_v7, %v63_v7 }
  0x2a   :  { %p153_p5 = por %p152_p4, %p151_p3 }
  0x2b   :  { %v65_v10 = vadd.f32 %v64_v9, %v60_v8 }
  0x2c   :  { %p154_p6 = pnand %p153_p5, %p147_p2 }
  0xa6   :  { %v76_v11 = vpop.permute.xlu0 %75 }
  0xa7   :  { %v78_v12 = vmul.f32 %v76_v11, %v65_v10 }
  0xa9   :  { %79 = vst [vmem:[#allocation7] sm:$0xff] %v78_v12 }
  0xaa   :  { %157 = shalt.err (!%p154_p6)
}
  0xab   :  { %s158_s13 = scalar_lea.hbm %s240_s3, 128 }
  0xac   :  { %p159_p7 = scmp.ne.s32.totalorder %s240_s3, %s158_s13  ;;  %p162_p8 = scmp.lt.u32.totalorder %s158_s13, %s240_s3 }
  0xae   :  { %p164_p9 = pnand %p162_p8, %p159_p7 }
  0xb0   :  { %167 = shalt.err (!%p164_p9)
}
  0xb1   :  { %89 = dma.vmem_to_hbm [thread:$0]  %s87_s10, 128, %s240_s3, [#allocation4]  }
  0xb2   :  { %172 = dma.done.wait [#allocation4], 128  }
  0xb3   :  { %173 = vsyncadd [#allocation4], 4294967168 }
  0xb4   :  { %93 = vsyncpa [#allocation3], 1 }
  0xb5   :  { %94 = vsyncpa [#allocation6], 1 }
  0xb6   :  { %95 = vsyncpa [#allocation4], 1 }

</bundles_post_ra>
